<compile_context>
chip_gen: v7x
topology: tpu7x:2x2x1
jax: 0.10.0
libtpu: 0.0.40
codegen_flags: <defaults>
</compile_context>

<pallas_src>
import jax
import jax.numpy as jnp
from jax import lax
from jax.experimental import pallas as pl
from jax.experimental.pallas import tpu as pltpu

MELODY_SIZE = 459
CHORD_SIZE = 84
METER_SIZE = 16
HIDDEN2_SIZE = 84
OUTPUT_SIZE = MELODY_SIZE

LANE = 128


def _round_up(n, m):
    return ((n + m - 1) // m) * m


# Lane-aligned kernel-side input layout:
#   cols [0, 459)            melody / state units
#   cols [459, 512)          zero pad
#   cols [512, 596)          chord units          (CHORD_COL0 is 128-aligned)
#   cols [596, 596+16+nz)    meter units (+ optional noise)
#   cols [..., in_pad)       zero pad
MELODY_PAD = _round_up(MELODY_SIZE, LANE)        # 512
CHORD_COL0 = MELODY_PAD                          # 512
METER_COL0 = CHORD_COL0 + CHORD_SIZE             # 596

H2_PAD = _round_up(HIDDEN2_SIZE, LANE)           # 128
OUT_PAD = _round_up(OUTPUT_SIZE, LANE)           # 512


def _in_pad_width(input_size):
    """Padded input width for the lane-aligned layout."""
    rest = input_size - MELODY_SIZE - CHORD_SIZE     # meter (+ noise) units
    return _round_up(METER_COL0 + rest, LANE)


# ----------------------------------------------------------------------------
# Kernel
# ----------------------------------------------------------------------------
def mnet_kernel(x_ref, w1_ref, b1_ref, w21ch_ref, b21_ref, wcomb_ref,
                bcomb_ref, o_ref):
    x = x_ref[...]                                       # (bb, in_pad) bf16

    # hidden1 = relu(X @ W1 + b1); bf16 operands, f32 accumulate / bias / ReLU.
    h1 = jnp.dot(x, w1_ref[...], preferred_element_type=jnp.float32)
    h1 = jnp.maximum(h1 + b1_ref[...], 0.0)
    # dropout: identity in eval mode.

    # hidden2 = relu([h1 | chord] @ [W21 ; Wchord] + b21).  The chord block is
    # a static 128-aligned slice of the already-resident X tile (no extra DMA);
    # rows 84:128 of the stacked weight's chord half are zero, so the meter/pad
    # columns caught by the slice contribute exactly nothing.
    chord = x[:, CHORD_COL0:CHORD_COL0 + LANE]           # (bb, 128) bf16
    h2_in = jnp.concatenate([h1.astype(w21ch_ref.dtype), chord], axis=-1)
    h2 = jnp.dot(h2_in, w21ch_ref[...], preferred_element_type=jnp.float32)
    h2 = jnp.maximum(h2 + b21_ref[...], 0.0)

    # merged output head: h2 @ (Wfixed + Wlearn) + blearn; bf16 lane-dense store.
    out = jnp.dot(h2.astype(wcomb_ref.dtype), wcomb_ref[...],
                  preferred_element_type=jnp.float32)
    o_ref[...] = (out + bcomb_ref[...]).astype(o_ref.dtype)


# ----------------------------------------------------------------------------
# Host-side preparation (do once / upstream, not per kernel call)
# ----------------------------------------------------------------------------
def prepare_input(x):
    """Relayout [melody | chord | meter(+noise)] -> lane-aligned bf16 X.

    Single fused pad + cast + relayout pass (one concatenate); 0/1 unit
    activations are exact in bf16.  Reuse the result across calls.
    """
    B, in_size = x.shape
    pad_w = _in_pad_width(in_size)
    xb = x.astype(jnp.bfloat16)
    melody = xb[:, :MELODY_SIZE]
    chord = xb[:, MELODY_SIZE:MELODY_SIZE + CHORD_SIZE]
    rest = xb[:, MELODY_SIZE + CHORD_SIZE:]              # meter (+ noise)
    z_mel = jnp.zeros((B, CHORD_COL0 - MELODY_SIZE), jnp.bfloat16)
    z_tail = jnp.zeros((B, pad_w - METER_COL0 - rest.shape[1]), jnp.bfloat16)
    return jnp.concatenate([melody, z_mel, chord, rest, z_tail], axis=-1)


def prepare_kernel_params(params):
    """Pad/relayout weights for the kernel: W1 rows follow the lane-aligned X
    layout, W21/Wchord are stacked into a single K=(h1_pad+128) weight, the two
    output heads are merged (Wfixed + Wlearn — exact by distributivity), and
    matmul operands are cast to bf16 (accumulation stays f32 in-kernel)."""
    w1, b1, w21, b21, wch, wfix, wlearn, blearn = params
    in_size, h1 = w1.shape
    pad_w = _in_pad_width(in_size)
    h1_pad = _round_up(h1, LANE)
    rest = in_size - MELODY_SIZE - CHORD_SIZE

    w1p = jnp.zeros((pad_w, h1_pad), jnp.float32)
    w1p = w1p.at[:MELODY_SIZE, :h1].set(w1[:MELODY_SIZE])
    w1p = w1p.at[CHORD_COL0:CHORD_COL0 + CHORD_SIZE, :h1].set(
        w1[MELODY_SIZE:MELODY_SIZE + CHORD_SIZE])
    w1p = w1p.at[METER_COL0:METER_COL0 + rest, :h1].set(
        w1[MELODY_SIZE + CHORD_SIZE:])
    b1p = jnp.zeros((1, h1_pad), jnp.float32).at[:, :h1].set(b1)

    w21p = jnp.zeros((h1_pad, H2_PAD), jnp.float32).at[:h1, :HIDDEN2_SIZE].set(w21)
    wchp = jnp.zeros((LANE, H2_PAD), jnp.float32).at[:CHORD_SIZE, :HIDDEN2_SIZE].set(wch)
    w21ch = jnp.concatenate([w21p, wchp], axis=0)        # (h1_pad + 128, 128)
    b21p = jnp.zeros((1, H2_PAD), jnp.float32).at[:, :HIDDEN2_SIZE].set(b21)

    wcomb = wfix + wlearn                                # merge output heads
    wcombp = jnp.zeros((H2_PAD, OUT_PAD), jnp.float32).at[
        :HIDDEN2_SIZE, :OUTPUT_SIZE].set(wcomb)
    bcombp = jnp.zeros((1, OUT_PAD), jnp.float32).at[:, :OUTPUT_SIZE].set(blearn)

    bf = lambda a: a.astype(jnp.bfloat16)
    return (bf(w1p), b1p, bf(w21ch), b21p, bf(wcombp), bcombp)


# ----------------------------------------------------------------------------
# Forward wrapper
# ----------------------------------------------------------------------------
def _choose_block_b(B, *, target_steps=4, max_block_b=1024):
    """round_up(cdiv(B, target_steps), 8): keeps batch-padding waste to a few
    rows per step while giving each core several grid steps; capped at 1024 so
    the double-buffered working set fits even v5e's 16 MiB default scoped
    VMEM (1024x640 bf16 in + 1024x512 bf16 out ~ 4.5 MB double-buffered)."""
    bb = _round_up(pl.cdiv(B, target_steps), 8)
    return int(min(max(bb, 16), max_block_b))


def melodynet_forward(xp, kernel_params, *, block_b=None, out_dtype=jnp.bfloat16):
    """xp: (B, in_pad) bf16 from prepare_input.

    Returns the PADDED (round_up(B, block_b), 512) output; consumers should
    either use it directly or take a single lax.slice to (B, 459) (padded
    rows carry bias-only junk, padded cols are zero-weight junk).
    """
    B, pad_w = xp.shape
    w1, b1, w21ch, b21, wcomb, bcomb = kernel_params
    h1_pad = w1.shape[1]

    if block_b is None:
        block_b = _choose_block_b(B)
    block_b = min(block_b, _round_up(B, 8))
    Bp = _round_up(B, block_b)
    if Bp != B:
        xp = jnp.pad(xp, ((0, Bp - B), (0, 0)))

    grid = (Bp // block_b,)
    const = lambda i: (0, 0)   # weights/biases: whole array, resident in VMEM

    out = pl.pallas_call(
        mnet_kernel,
        out_shape=jax.ShapeDtypeStruct((Bp, OUT_PAD), out_dtype),
        grid=grid,
        in_specs=[
            pl.BlockSpec((block_b, pad_w), lambda i: (i, 0)),        # X (fused chord)
            pl.BlockSpec((pad_w, h1_pad), const),                    # W1
            pl.BlockSpec((1, h1_pad), const),                        # b1
            pl.BlockSpec((h1_pad + LANE, H2_PAD), const),            # [W21 ; Wchord]
            pl.BlockSpec((1, H2_PAD), const),                        # b21
            pl.BlockSpec((H2_PAD, OUT_PAD), const),                  # Wfixed + Wlearn
            pl.BlockSpec((1, OUT_PAD), const),                       # blearn
        ],
        out_specs=pl.BlockSpec((block_b, OUT_PAD), lambda i: (i, 0)),
        compiler_params=pltpu.CompilerParams(
            dimension_semantics=("parallel",)),
    )(xp, w1, b1, w21ch, b21, wcomb, bcomb)
    return out


# ----------------------------------------------------------------------------
# Synthetic parameters + pure-JAX reference (mirrors MelodyNet.__init__/forward)
# ----------------------------------------------------------------------------
def _linear_init(key, fan_in, fan_out):
    """PyTorch-style uniform(-1/sqrt(fan_in), 1/sqrt(fan_in)), (in, out) layout."""
    kw, kb = jax.random.split(key)
    bound = 1.0 / jnp.sqrt(jnp.float32(fan_in))
    w = jax.random.uniform(kw, (fan_in, fan_out), jnp.float32, -bound, bound)
    b = jax.random.uniform(kb, (1, fan_out), jnp.float32, -bound, bound)
    return w, b


def make_params(key, *, hidden1_size, inject_noise=False, noise_size=0,
                fixed_chords=True, chord_weight=1.0,
                melody_weight=1.0, rest_fixed_weight=0.5):
    """Deterministic, synthetic parameter construction mirroring MelodyNet.__init__."""
    noise = noise_size if inject_noise else 0
    input_size = MELODY_SIZE + CHORD_SIZE + METER_SIZE + noise

    k1, k2, k3, k4 = jax.random.split(key, 4)

    w1, b1 = _linear_init(k1, input_size, hidden1_size)
    w21, b21 = _linear_init(k2, hidden1_size, HIDDEN2_SIZE)

    # hidden2_from_chord: Linear(84, 84, bias=False); if fixed_chords, diag = chord_weight.
    bound = 1.0 / jnp.sqrt(jnp.float32(CHORD_SIZE))
    wch_pt = jax.random.uniform(k3, (HIDDEN2_SIZE, CHORD_SIZE), jnp.float32, -bound, bound)
    if fixed_chords:
        diag = jnp.arange(HIDDEN2_SIZE)
        wch_pt = wch_pt.at[diag, diag].set(chord_weight)
    wch = wch_pt.T  # (in=84, out=84)

    # output_fixed: synthetic deterministic stand-in for the note/chord mapping
    # table (NOTE_STR_TO_IDX_MNET / CHORD_NOTES are not available here).
    rows = jnp.arange(OUTPUT_SIZE)[:, None]
    cols = jnp.arange(HIDDEN2_SIZE)[None, :]
    pattern = ((rows * 7 + cols * 3) % 13 == 0).astype(jnp.float32)
    ofw = jnp.where(rows < 41, jnp.float32(1.0), pattern)          # rows 0:41 -> all ones
    ofw = ofw / jnp.maximum(ofw.sum(axis=1, keepdims=True), 1e-12) * melody_weight
    ofw = ofw.at[0:41].multiply(rest_fixed_weight)
    wfix = ofw.T  # (hidden2, output)

    # output_learnable: Linear(84, 459) with bias.
    wlearn, blearn = _linear_init(k4, HIDDEN2_SIZE, OUTPUT_SIZE)

    return input_size, (w1, b1, w21, b21, wch, wfix, wlearn, blearn)


def reference_forward(x, params):
    """Pure-JAX f32 reference of the original module forward (eval mode)."""
    w1, b1, w21, b21, wch, wfix, wlearn, blearn = params
    hp = lax.Precision.HIGHEST
    h1 = jnp.maximum(jnp.dot(x, w1, precision=hp) + b1, 0.0)
    chord = x[:, MELODY_SIZE:MELODY_SIZE + CHORD_SIZE]
    h2 = jnp.maximum(jnp.dot(h1, w21, precision=hp) + b21
                     + jnp.dot(chord, wch, precision=hp), 0.0)
    return (jnp.dot(h2, wfix, precision=hp)
            + jnp.dot(h2, wlearn, precision=hp) + blearn)


if __name__ == "__main__":
    key = jax.random.PRNGKey(0)
    kx, kp = jax.random.split(key)

    hidden1_size = 64
    batch = 64                      # small test shape -> 4 grid steps of 16 rows

    input_size, raw_params = make_params(
        kp, hidden1_size=hidden1_size,
        inject_noise=False, noise_size=0,
        fixed_chords=True, chord_weight=2.0,
        melody_weight=1.5, rest_fixed_weight=0.25,
    )
    kernel_params = prepare_kernel_params(raw_params)

    # One-hot-ish sparse 0/1 input, like (state | chord | meter) unit activations.
    x = (jax.random.uniform(kx, (batch, input_size), jnp.float32) > 0.9).astype(jnp.float32)

    xp = prepare_input(x)                        # one fused pad + cast + relayout
    out_padded = melodynet_forward(xp, kernel_params)
    out_padded = jax.block_until_ready(out_padded)

    # Single combined batch+feature slice (or consume the padded buffer directly).
    out = lax.slice(out_padded, (0, 0), (batch, OUTPUT_SIZE))

    ref = reference_forward(x, raw_params)
    assert out.shape == (batch, OUTPUT_SIZE)
    # bf16 matmul operands + bf16 output store vs f32 reference -> ~1e-2 rounding.
    assert jnp.allclose(out.astype(jnp.float32), ref, atol=6e-2, rtol=2e-2), \
        "mismatch vs pure-JAX reference"

    print("KERNEL_OK")
</pallas_src>

<mosaic_0001>
module attributes {stable_mosaic.version = 11 : i64} {
  func.func @mnet_kernel(%arg0: i32, %arg1: memref<16x640xbf16, #tpu.memory_space<vmem>>, %arg2: memref<640x128xbf16, #tpu.memory_space<vmem>>, %arg3: memref<1x128xf32, #tpu.memory_space<vmem>>, %arg4: memref<256x128xbf16, #tpu.memory_space<vmem>>, %arg5: memref<1x128xf32, #tpu.memory_space<vmem>>, %arg6: memref<128x512xbf16, #tpu.memory_space<vmem>>, %arg7: memref<1x512xf32, #tpu.memory_space<vmem>>, %arg8: memref<16x512xbf16, #tpu.memory_space<vmem>>) attributes {dimension_semantics = [#tpu.dimension_semantics<parallel>], iteration_bounds = array<i64: 4>, scalar_prefetch = 0 : i64, scratch_operands = 0 : i64, tpu.core_type = #tpu.core_type<tc>, window_params = [{transform_indices = @transform_0, window_bounds = array<i64: 16, 640>}, {pipeline_mode = #tpu.pipeline_mode<synchronous>, transform_indices = @transform_1, window_bounds = array<i64: 640, 128>}, {pipeline_mode = #tpu.pipeline_mode<synchronous>, transform_indices = @transform_2, window_bounds = array<i64: 1, 128>}, {pipeline_mode = #tpu.pipeline_mode<synchronous>, transform_indices = @transform_3, window_bounds = array<i64: 256, 128>}, {pipeline_mode = #tpu.pipeline_mode<synchronous>, transform_indices = @transform_4, window_bounds = array<i64: 1, 128>}, {pipeline_mode = #tpu.pipeline_mode<synchronous>, transform_indices = @transform_5, window_bounds = array<i64: 128, 512>}, {pipeline_mode = #tpu.pipeline_mode<synchronous>, transform_indices = @transform_6, window_bounds = array<i64: 1, 512>}, {transform_indices = @transform_7, window_bounds = array<i64: 16, 512>}]} {
    %c0 = arith.constant 0 : index
    %c0_0 = arith.constant 0 : index
    %0 = vector.load %arg1[%c0, %c0_0] : memref<16x640xbf16, #tpu.memory_space<vmem>>, vector<16x640xbf16>
    %c0_1 = arith.constant 0 : index
    %c0_2 = arith.constant 0 : index
    %1 = vector.load %arg2[%c0_1, %c0_2] : memref<640x128xbf16, #tpu.memory_space<vmem>>, vector<640x128xbf16>
    %cst = arith.constant dense<0.000000e+00> : vector<16x128xf32>
    %2 = tpu.matmul %0, %1, %cst {dimension_numbers = #tpu.dot_dimension_numbers<[1], [0], [0], [1], [0, 0, 1, 1], [], []>} : vector<16x640xbf16>, vector<640x128xbf16>, vector<16x128xf32> -> vector<16x128xf32>
    %c0_3 = arith.constant 0 : index
    %c0_4 = arith.constant 0 : index
    %3 = vector.load %arg3[%c0_3, %c0_4] : memref<1x128xf32, #tpu.memory_space<vmem>>, vector<1x128xf32>
    %4 = vector.broadcast %3 : vector<1x128xf32> to vector<16x128xf32>
    %5 = arith.addf %2, %4 : vector<16x128xf32>
    %cst_5 = arith.constant 0.000000e+00 : f32
    %6 = vector.broadcast %cst_5 : f32 to vector<16x128xf32>
    %7 = arith.maximumf %5, %6 : vector<16x128xf32>
    %8 = vector.extract_strided_slice %0 {offsets = [0, 512], sizes = [16, 128], strides = [1, 1]} : vector<16x640xbf16> to vector<16x128xbf16>
    %9 = arith.truncf %7 : vector<16x128xf32> to vector<16x128xbf16>
    %10 = tpu.concatenate %9, %8 in 1 : vector<16x128xbf16>, vector<16x128xbf16> -> vector<16x256xbf16>
    %c0_6 = arith.constant 0 : index
    %c0_7 = arith.constant 0 : index
    %11 = vector.load %arg4[%c0_6, %c0_7] : memref<256x128xbf16, #tpu.memory_space<vmem>>, vector<256x128xbf16>
    %cst_8 = arith.constant dense<0.000000e+00> : vector<16x128xf32>
    %12 = tpu.matmul %10, %11, %cst_8 {dimension_numbers = #tpu.dot_dimension_numbers<[1], [0], [0], [1], [0, 0, 1, 1], [], []>} : vector<16x256xbf16>, vector<256x128xbf16>, vector<16x128xf32> -> vector<16x128xf32>
    %c0_9 = arith.constant 0 : index
    %c0_10 = arith.constant 0 : index
    %13 = vector.load %arg5[%c0_9, %c0_10] : memref<1x128xf32, #tpu.memory_space<vmem>>, vector<1x128xf32>
    %14 = vector.broadcast %13 : vector<1x128xf32> to vector<16x128xf32>
    %15 = arith.addf %12, %14 : vector<16x128xf32>
    %cst_11 = arith.constant 0.000000e+00 : f32
    %16 = vector.broadcast %cst_11 : f32 to vector<16x128xf32>
    %17 = arith.maximumf %15, %16 : vector<16x128xf32>
    %18 = arith.truncf %17 : vector<16x128xf32> to vector<16x128xbf16>
    %c0_12 = arith.constant 0 : index
    %c0_13 = arith.constant 0 : index
    %19 = vector.load %arg6[%c0_12, %c0_13] : memref<128x512xbf16, #tpu.memory_space<vmem>>, vector<128x512xbf16>
    %cst_14 = arith.constant dense<0.000000e+00> : vector<16x512xf32>
    %20 = tpu.matmul %18, %19, %cst_14 {dimension_numbers = #tpu.dot_dimension_numbers<[1], [0], [0], [1], [0, 0, 1, 1], [], []>} : vector<16x128xbf16>, vector<128x512xbf16>, vector<16x512xf32> -> vector<16x512xf32>
    %c0_15 = arith.constant 0 : index
    %c0_16 = arith.constant 0 : index
    %21 = vector.load %arg7[%c0_15, %c0_16] : memref<1x512xf32, #tpu.memory_space<vmem>>, vector<1x512xf32>
    %22 = vector.broadcast %21 : vector<1x512xf32> to vector<16x512xf32>
    %23 = arith.addf %20, %22 : vector<16x512xf32>
    %24 = arith.truncf %23 : vector<16x512xf32> to vector<16x512xbf16>
    %c0_17 = arith.constant 0 : index
    %c0_18 = arith.constant 0 : index
    %25 = vector.load %arg8[%c0_17, %c0_18] : memref<16x512xbf16, #tpu.memory_space<vmem>>, vector<16x512xbf16>
    tpu.vector_store %arg8[%c0_17, %c0_18], %24 {strides = array<i32>} : memref<16x512xbf16, #tpu.memory_space<vmem>>, vector<16x512xbf16>,
    return
  }
  func.func @transform_0(%arg0: i32) -> (i32, i32) {
    %c0_i32 = arith.constant 0 : i32
    %c0_i32_0 = arith.constant 0 : i32
    return %arg0, %c0_i32 : i32, i32
  }
  func.func @transform_1(%arg0: i32) -> (i32, i32) {
    %c0_i32 = arith.constant 0 : i32
    %c0_i32_0 = arith.constant 0 : i32
    %c0_i32_1 = arith.constant 0 : i32
    return %c0_i32, %c0_i32_0 : i32, i32
  }
  func.func @transform_2(%arg0: i32) -> (i32, i32) {
    %c0_i32 = arith.constant 0 : i32
    %c0_i32_0 = arith.constant 0 : i32
    %c0_i32_1 = arith.constant 0 : i32
    return %c0_i32, %c0_i32_0 : i32, i32
  }
  func.func @transform_3(%arg0: i32) -> (i32, i32) {
    %c0_i32 = arith.constant 0 : i32
    %c0_i32_0 = arith.constant 0 : i32
    %c0_i32_1 = arith.constant 0 : i32
    return %c0_i32, %c0_i32_0 : i32, i32
  }
  func.func @transform_4(%arg0: i32) -> (i32, i32) {
    %c0_i32 = arith.constant 0 : i32
    %c0_i32_0 = arith.constant 0 : i32
    %c0_i32_1 = arith.constant 0 : i32
    return %c0_i32, %c0_i32_0 : i32, i32
  }
  func.func @transform_5(%arg0: i32) -> (i32, i32) {
    %c0_i32 = arith.constant 0 : i32
    %c0_i32_0 = arith.constant 0 : i32
    %c0_i32_1 = arith.constant 0 : i32
    return %c0_i32, %c0_i32_0 : i32, i32
  }
  func.func @transform_6(%arg0: i32) -> (i32, i32) {
    %c0_i32 = arith.constant 0 : i32
    %c0_i32_0 = arith.constant 0 : i32
    %c0_i32_1 = arith.constant 0 : i32
    return %c0_i32, %c0_i32_0 : i32, i32
  }
  func.func @transform_7(%arg0: i32) -> (i32, i32) {
    %c0_i32 = arith.constant 0 : i32
    %c0_i32_0 = arith.constant 0 : i32
    return %arg0, %c0_i32 : i32, i32
  }
}

</mosaic_0001>

<bundles_post_ra>
// kernel: tpu_custom_call.1
= control target key start
LH: loop header
LB: loop body
LE: loop exit
PB: predicated region body
PF: predicated region fallthrough
CT: control target
= control target key end

     0   :  { %12 = vsyncpa [#allocation3], 0  ;;  %s2396_s0 = inlined_call_operand.hbm [shape: bf16[64,640], index: 0, kind: input, shape index: {}]   ;;  %s2397_s1 = inlined_call_operand.hbm [shape: bf16[640,128], index: 1, kind: input, shape index: {}]   ;;  %s2398_s2 = inlined_call_operand.vmem [shape: f32[1,128], index: 2, kind: input, shape index: {}]   ;;  %s2399_s3 = inlined_call_operand.hbm [shape: bf16[256,128], index: 3, kind: input, shape index: {}]   ;;  %s2400_s4 = inlined_call_operand.vmem [shape: f32[1,128], index: 4, kind: input, shape index: {}]   ;;  %s2401_s5 = inlined_call_operand.hbm [shape: bf16[128,512], index: 5, kind: input, shape index: {}]   ;;  %s2402_s6 = inlined_call_operand.vmem [shape: f32[1,512], index: 6, kind: input, shape index: {}]   ;;  %s2403_s7 = inlined_call_operand.hbm [shape: bf16[64,512], index: 7, kind: output, shape index: {}]  }
   0x1   :  { %14 = vsyncpa [#allocation3 + $0x1], 0 }
   0x2   :  { %15 = vsyncpa [#allocation6], 0 }
   0x3   :  { %16 = vsyncpa [#allocation9], 0 }
   0x4   :  { %17 = vsyncpa [#allocation4], 0 }
   0x5   :  { %19 = vsyncpa [#allocation4 + $0x1], 0  ;;  %s2122_s24 = smov 0   ;;  %s2124_s25 = smov 0  }
   0x6   :  { %s2126_s26 = smov 0   ;;  %s2128_s27 = smov 0  }
   0x7 LB: > { %s2143_s28 = sadd.s32 4294967295, %s2064_s27   ;;  %s1454_s29 = sadd.s32 4294967294, %s2064_s27   ;;  %s2064_s27 = sphi %s2128_s27, %s2428_s27   ;;  %s2060_s26 = sphi %s2126_s26, %s2427_s26   ;;  %s2056_s25 = sphi %s2124_s25, %s2426_s25   ;;  %s2052_s24 = sphi %s2122_s24, %s2425_s24  }
   0x8   : > { %p45_p0 = scmp.ne.s32.totalorder %s2056_s25, %s2052_s24  ;;  %p2404_p1 = scmp.eq.s32.totalorder %s2143_s28, 0 }
   0x9   : > { %p201_p3 = scmp.eq.s32.totalorder %s1454_s29, 3  ;;  %p1455_p5 = scmp.ge.s32.totalorder %s2064_s27, 1 }
   0xa   : > { %p2152_p4 = por %p2404_p1, %p45_p0  ;;  %p208_p7 = scmp.lt.s32.totalorder %s2064_s27, 5 }
   0xb   : > { %p2157_p6 = por %p201_p3, %p45_p0  ;;  %s2066_s10 = smov [#allocation5]  }
   0xc   : > { %s2408_s30 = scalar_select %p2152_p4, 1, 0 }
   0xd   : > { %s2409_s8 = scalar_select %p2157_p6, 1, 0 }
   0xe   : > { %p2162_p8 = pnand %p1455_p5, %p208_p7  ;;  %s220_s11 = sshll.u32 %s2066_s10, 4  ;;  %s2166_s11 = int_to_ptr.vmem [resolvable:$true] %s220_s11 }
   0xf   : > { %2410 = sst [smem:[#allocation15_spill]] %s2409_s8  ;;  %s2067_s13 = smov [#allocation7]  }
  0x10   : > { %s2411_s9 = scalar_select %p2162_p8, 1, 0 }
  0x11   : > { %p1693_p9 = pneg %p2162_p8  ;;  %s236_s14 = sshll.u32 %s2067_s13, 4  ;;  %s2176_s14 = int_to_ptr.vmem [resolvable:$true] %s236_s14 }
  0x12   : > { %s2068_s15 = smov [#allocation8]   ;;  %s1876_s19 = scalar_lea.hbm %s2397_s1, 5120 }
  0x13   : > { %p2172_p10 = pnand %p1693_p9, %p2404_p1  ;;  %s2178_s16 = sshll.u32 %s2068_s15, 4  ;;  %s253_s16 = int_to_ptr.vmem [resolvable:$true] %s2178_s16 }
  0x14   : > { %p1877_p11 = scmp.ne.s32.totalorder %s2397_s1, %s1876_s19  ;;  %p1883_p3 = scmp.lt.u32.totalorder %s1876_s19, %s2397_s1 }
  0x15   : > { %p2188_p12 = pneg %p2172_p10 }
  0x17   : > { %p1879_p13 = pnand %p2188_p12, %p1877_p11 }
  0x19   : > { %p1880_p0 = pneg %p1879_p13 }
  0x1b   : > { %p1885_p5 = pnand %p1883_p3, %p1880_p0 }
  0x1d   : > { %1888 = shalt.err (!%p1885_p5)
}
  0x1e   : > { %s1889_s10 = scalar_lea.vmem %s2166_s11, 5120  ;;  %p1897_p2 = scmp.lt.s32.totalorder %s2166_s11, %s2166_s11 }
  0x1f   : > { %p1890_p7 = scmp.ne.s32.totalorder %s2166_s11, %s1889_s10  ;;  %p1898_p6 = scmp.lt.s32.totalorder %s1889_s10, %s1889_s10 }
  0x21   : > { %p1892_p9 = pnand %p1890_p7, %p2188_p12  ;;  %p1899_p11 = por %p1898_p6, %p1897_p2 }
  0x23   : > { %p1893_p1 = pneg %p1892_p9 }
  0x25   : > { %p1900_p13 = pnand %p1899_p11, %p1893_p1 }
  0x27   : > { %1903 = shalt.err (!%p1900_p13)
}
  0x28   : > { %s2069_s13 = smov 64   ;;  %s2070_s15 = smov 4  }
  0x29   : > { %1696 = dma.hbm_to_vmem [thread:$0]  (!%p2172_p10), %s2397_s1, 5120, %s2166_s11, [#allocation6], %s2069_s13, %s2069_s13, %s2070_s15  }
  0x2a   : > { %s1904_s21 = scalar_lea.hbm %s2399_s3, 2048 }
  0x2b   : > { %p1905_p2 = scmp.ne.s32.totalorder %s2399_s3, %s1904_s21  ;;  %p1911_p0 = scmp.lt.u32.totalorder %s1904_s21, %s2399_s3 }
  0x2d   : > { %p1907_p1 = pnand %p1905_p2, %p2188_p12 }
  0x2f   : > { %p1908_p6 = pneg %p1907_p1 }
  0x31   : > { %p1913_p3 = pnand %p1911_p0, %p1908_p6 }
  0x33   : > { %1916 = shalt.err (!%p1913_p3)
}
  0x34   : > { %s1917_s11 = scalar_lea.vmem %s2176_s14, 2048  ;;  %p1925_p11 = scmp.lt.s32.totalorder %s2176_s14, %s2176_s14 }
  0x35   : > { %p1918_p5 = scmp.ne.s32.totalorder %s2176_s14, %s1917_s11  ;;  %p1926_p13 = scmp.lt.s32.totalorder %s1917_s11, %s1917_s11 }
  0x37   : > { %p1920_p7 = pnand %p1918_p5, %p2188_p12  ;;  %p1927_p2 = por %p1926_p13, %p1925_p11 }
  0x39   : > { %p1921_p9 = pneg %p1920_p7 }
  0x3b   : > { %p1928_p1 = pnand %p1927_p2, %p1921_p9 }
  0x3d   : > { %1931 = shalt.err (!%p1928_p1)
}
  0x3e   : > { %1699 = dma.hbm_to_vmem [thread:$0]  (!%p2172_p10), %s2399_s3, 2048, %s2176_s14, [#allocation6], %s2069_s13, %s2069_s13, %s2070_s15  }
  0x3f   : > { %s1932_s20 = scalar_lea.hbm %s2401_s5, 4096 }
  0x40   : > { %p1933_p6 = scmp.ne.s32.totalorder %s2401_s5, %s1932_s20  ;;  %p1939_p5 = scmp.lt.u32.totalorder %s1932_s20, %s2401_s5 }
  0x42   : > { %p1935_p0 = pnand %p1933_p6, %p2188_p12 }
  0x44   : > { %p1936_p3 = pneg %p1935_p0 }
  0x46   : > { %p1941_p7 = pnand %p1939_p5, %p1936_p3 }
  0x48   : > { %1944 = shalt.err (!%p1941_p7)
}
  0x49   : > { %s1945_s11 = scalar_lea.vmem %s253_s16, 4096  ;;  %p1953_p2 = scmp.lt.s32.totalorder %s253_s16, %s253_s16 }
  0x4a   : > { %p1946_p9 = scmp.ne.s32.totalorder %s253_s16, %s1945_s11  ;;  %p1954_p1 = scmp.lt.s32.totalorder %s1945_s11, %s1945_s11 }
  0x4c   : > { %p1948_p11 = pnand %p1946_p9, %p2188_p12  ;;  %p1955_p4 = por %p1954_p1, %p1953_p2 }
  0x4e   : > { %p1949_p13 = pneg %p1948_p11 }
  0x50   : > { %p1956_p8 = pnand %p1955_p4, %p1949_p13 }
  0x52   : > { %1959 = shalt.err (!%p1956_p8)
}
  0x53   : > { %s2071_s14 = smov 256   ;;  %s2072_s22 = smov 16  }
  0x54   : > { %1702 = dma.hbm_to_vmem [thread:$0]  (!%p2172_p10), %s2401_s5, 4096, %s253_s16, [#allocation9], %s2071_s14, %s2071_s14, %s2072_s22  }
  0x55   : > { %s2252_s8 = sadd.s32 1, %s2064_s27   ;;  %s32_s18 = sadd.s32 1, %s2060_s26 }
  0x56   : > { %s29_s17 = ssub.s32 %s2064_s27, %s2252_s8  ;;  %p39_p8 = scmp.ne.s32.totalorder %s2060_s26, %s2056_s25 }
  0x57   : > { %p30_p4 = scmp.eq.s32.totalorder %s29_s17, 0  ;;  %p40_p12 = scmp.eq.s32.totalorder %s2064_s27, 0 }
  0x58   : > { %p1714_p6 = scmp.lt.s32.totalorder %s2064_s27, 4  ;;  %p2414_p3 = scmp.eq.s32.totalorder %s2143_s28, 3 }
  0x59   : > { %s2262_s19 = scalar_select %p30_p4, %s2060_s26, %s32_s18  }
  0x5a   : > { %p41_p0 = por %p40_p12, %p39_p8  ;;  %p2266_p5 = por %p2414_p3, %p39_p8 }
  0x5b   : > { %s269_s12 = sand.u32 1, %s2060_s26   ;;  %s1675_s21 = smul.u32 640, %s2064_s27 }
  0x5c   : > { %s1674_s16 = smul.u32 40, %s269_s12  ;;  %p2277_p10 = pnand %p1714_p6, %p41_p0 }
  0x5d   : > { %s2275_s10 = scalar_lea.hbm %s2396_s0, %s1675_s21  ;;  %s2283_s13 = scalar_lea.sflag [#allocation3], %s269_s12 }
  0x5e   : > { %s273_s14 = scalar_lea.vmem [#allocation2], %s1674_s16  ;;  %s1960_s15 = scalar_lea.hbm %s2275_s10, 640 }
  0x5f   : > { %s281_s22 = sshll.u32 %s273_s14, 4  ;;  %p1961_p7 = scmp.ne.s32.totalorder %s2275_s10, %s1960_s15  ;;  %s2281_s22 = int_to_ptr.vmem [resolvable:$true] %s281_s22 }
  0x60   : > { %p1962_p9 = pneg %p2277_p10  ;;  %s1965_s21 = scalar_lea.hbm %s2396_s0, 2560 }
  0x61   : > { %p1966_p2 = scmp.lt.u32.totalorder %s2275_s10, %s2396_s0  ;;  %p1967_p1 = scmp.lt.u32.totalorder %s1965_s21, %s1960_s15 }
  0x62   : > { %p1963_p11 = pnand %p1962_p9, %p1961_p7  ;;  %p1969_p8 = scmp.lt.u32.totalorder %s1960_s15, %s2275_s10 }
  0x63   : > { %p1968_p4 = por %p1967_p1, %p1966_p2 }
  0x64   : > { %p1964_p13 = pneg %p1963_p11 }
  0x65   : > { %p1970_p12 = por %p1969_p8, %p1968_p4 }
  0x67   : > { %p1971_p6 = pnand %p1970_p12, %p1964_p13 }
  0x69   : > { %1974 = shalt.err (!%p1971_p6)
}
  0x6a   : > { %s1975_s12 = scalar_lea.vmem %s2281_s22, 640  ;;  %s2073_s16 = smov [#allocation2]  }
  0x6b   : > { %p1976_p0 = scmp.ne.s32.totalorder %s2281_s22, %s1975_s12  ;;  %s1980_s14 = sshll.u32 %s2073_s16, 4  ;;  %s1981_s14 = int_to_ptr.vmem [resolvable:$false] %s1980_s14 }
  0x6c   : > { %s1982_s17 = scalar_lea.vmem %s1981_s14, 1280  ;;  %p1983_p11 = scmp.lt.s32.totalorder %s2281_s22, %s1981_s14 }
  0x6d   : > { %p1978_p3 = pnand %p1976_p0, %p1962_p9  ;;  %p1984_p2 = scmp.lt.s32.totalorder %s1982_s17, %s1975_s12 }
  0x6f   : > { %p1979_p7 = pneg %p1978_p3  ;;  %p1985_p1 = por %p1984_p2, %p1983_p11 }
  0x71   : > { %p1986_p4 = pnand %p1985_p1, %p1979_p7 }
  0x73   : > { %1989 = shalt.err (!%p1986_p4)
}
  0x74   : > { %s2074_s15 = smov 320   ;;  %s2075_s18 = smov 20  }
  0x75   : > { %1706 = dma.hbm_to_vmem [thread:$0]  (!%p2277_p10), %s2275_s10, 640, %s2281_s22, %s2283_s13, %s2074_s15, %s2074_s15, %s2075_s18  }
  0x76   : > { %p2417_p9 = scmp.ne.s32.totalorder %s2411_s9, 0 }
  0x77   : > { %s2314_s21 = sand.u32 (!%p2417_p9), 1, %s2056_s25   ;;  %p2418_p13 = scmp.ne.s32.totalorder (!%p2417_p9), %s2408_s30, 0 }
  0x78   : > { %293 = sbr.rel (%p2417_p9) target bundleno = 877 (0x36d), region = 48  ;;  %s296_s29 = scalar_lea.sflag (!%p2417_p9), [#allocation3], %s2314_s21 }
  0x79   : > { %s1676_s23 = smul.u32 (!%p2417_p9), 40, %s2314_s21 }
  0x7b   : > { %s2318_s12 = scalar_lea.vmem (!%p2417_p9), [#allocation2], %s1676_s23 }
  0x7f   : > { %2035 = dma.done.wait (%p2418_p13), %s296_s29, 640  }
  0x80   : > { %2037 = vsyncadd (%p2418_p13), %s296_s29, 4294966656  ;;  %p2419_p10 = scmp.eq.s32.totalorder %s2143_s28, 0 }
  0x82   : > { %2039 = dma.done.wait (%p2419_p10), [#allocation6], 7168   ;;  %p2420_p8 = pmov %p2419_p10 }
  0x84   : > { %2041 = vsyncadd (%p2420_p8), [#allocation6], 4294960128  ;;  %p2421_p12 = pmov %p2420_p8 }
  0x85   : > { %p2422_p6 = pmov %p2420_p8 }
  0x86   : > { %2043 = dma.done.wait (%p2421_p12), [#allocation9], 4096  }
  0x87   : > { %2045 = vsyncadd (%p2422_p6), [#allocation9], 4294963200  ;;  %v1765_v0 = vld [vmem:[#allocation5 + $0x40] sm:$0xff]   ;;  %v1769_v4 = vld [vmem:[#allocation5 + $0x48] sm:$0xff]   ;;  %v2076_v33 = vmov 0.0   ;;  %vm2077_vm0 = vmmov 0  }
  0x88   : > { %v1766_v1 = vld [vmem:[#allocation5] sm:$0xff]   ;;  %1579 = vmatprep.subr.bf16.mxu0 %v1765_v0  ;;  %v1770_v5 = vld [vmem:[#allocation5 + $0x8] sm:$0xff]   ;;  %v1773_v8 = vld [vmem:[#allocation5 + $0x50] sm:$0xff]   ;;  %s1467_s16 = sshll.u32 %s2314_s21, 5  ;;  %s1578_s15 = sshll.u32 %s2143_s28, 9 }
  0x89   : > { %v1767_v2 = vld [vmem:[#allocation5 + $0xc0] sm:$0xff]   ;;  %1580 = vmatpush3.bf16.msra.mxu0 %v1766_v1  ;;  %v1771_v6 = vld [vmem:[#allocation5 + $0xc8] sm:$0xff]   ;;  %v1774_v9 = vld [vmem:[#allocation5 + $0x10] sm:$0xff]   ;;  %s341_s14 = scalar_lea.vmem [#allocation10], %s1467_s16  ;;  %s2353_s29 = scalar_lea.hbm %s2403_s7, %s1578_s15 }
  0x8a   : > { %v1768_v3 = vld [vmem:[#allocation5 + $0x80] sm:$0xff]   ;;  %1601 = vmatprep.subr.bf16.mxu1 %v1767_v2  ;;  %1581 = vmatprep.subr.bf16.mxu0 %v1769_v4  ;;  %v1772_v7 = vld [vmem:[#allocation5 + $0x88] sm:$0xff]   ;;  %v1775_v10 = vld [vmem:[#allocation5 + $0xd0] sm:$0xff]   ;;  %s1352_s17 = sshll.u32 %s341_s14, 4  ;;  %s1338_s28 = scalar_lea.sflag [#allocation4], %s2314_s21  ;;  %s2348_s17 = int_to_ptr.vmem [resolvable:$true] %s1352_s17 }
  0x8b   : > { %1602 = vmatpush3.bf16.msra.mxu1 %v1768_v3  ;;  %v1776_v11 = vld [vmem:[#allocation5 + $0x90] sm:$0xff]   ;;  %v1777_v12 = vld [vmem:[#allocation5 + $0x58] sm:$0xff]   ;;  %v1781_v16 = vld [vmem:[#allocation5 + $0x60] sm:$0xff]   ;;  %s2079_s30 = smov [#allocation10]  }
  0x8c   : > { %1603 = vmatprep.subr.bf16.mxu1 %v1771_v6  ;;  %v1778_v13 = vld [vmem:[#allocation5 + $0x18] sm:$0xff]   ;;  %v1782_v17 = vld [vmem:[#allocation5 + $0x20] sm:$0xff]   ;;  %v1785_v20 = vld [vmem:[#allocation5 + $0x68] sm:$0xff]   ;;  %s1994_s9 = sshll.u32 %s2079_s30, 4  ;;  %s1995_s9 = int_to_ptr.vmem [resolvable:$false] %s1994_s9 }
  0x8d   : > { %1582 = vmatpush3.bf16.msra.mxu0 %v1770_v5  ;;  %v1779_v14 = vld [vmem:[#allocation5 + $0xd8] sm:$0xff]   ;;  %v1783_v18 = vld [vmem:[#allocation5 + $0xe0] sm:$0xff]   ;;  %v1786_v21 = vld [vmem:[#allocation5 + $0x28] sm:$0xff]   ;;  %s1996_s10 = scalar_lea.vmem %s1995_s9, 1024  ;;  %p1997_p11 = scmp.lt.s32.totalorder %s2348_s17, %s1995_s9 }
  0x8e   : > { %1583 = vmatprep.subr.bf16.mxu0 %v1773_v8  ;;  %v1780_v15 = vld [vmem:[#allocation5 + $0x98] sm:$0xff]   ;;  %v1784_v19 = vld [vmem:[#allocation5 + $0xa0] sm:$0xff]   ;;  %v1787_v22 = vld [vmem:[#allocation5 + $0xe8] sm:$0xff]  }
  0x8f   : > { %1604 = vmatpush3.bf16.msra.mxu1 %v1772_v7  ;;  %v1788_v23 = vld [vmem:[#allocation5 + $0xa8] sm:$0xff]   ;;  %v1789_v24 = vld [vmem:[#allocation5 + $0x70] sm:$0xff]   ;;  %v1793_v28 = vld [vmem:[#allocation5 + $0x78] sm:$0xff]  }
  0x90   : > { %1605 = vmatprep.subr.bf16.mxu1 %v1775_v10  ;;  %v1790_v25 = vld [vmem:[#allocation5 + $0x30] sm:$0xff]   ;;  %v1794_v29 = vld [vmem:[#allocation5 + $0x38] sm:$0xff]   ;;  %v1803_v37 = vld [vmem:[#allocation5 + $0x100] sm:$0xff]  }
  0x91   : > { %1584 = vmatpush3.bf16.msra.mxu0 %v1774_v9  ;;  %v1791_v26 = vld [vmem:[#allocation5 + $0xf0] sm:$0xff]   ;;  %v1795_v30 = vld [vmem:[#allocation5 + $0xf8] sm:$0xff]   ;;  %v1804_v38 = vld [vmem:[#allocation5 + $0x108] sm:$0xff]  }
  0x92   : > { %1585 = vmatprep.subr.bf16.mxu0 %v1777_v12  ;;  %v1792_v27 = vld [vmem:[#allocation5 + $0xb0] sm:$0xff]   ;;  %v1799_v34 = vld [vmem:[#allocation5 + $0xb8] sm:$0xff]   ;;  %v1807_v42 = vld [vmem:[#allocation5 + $0x120] sm:$0xff]  }
  0x93   : > { %1606 = vmatpush3.bf16.msra.mxu1 %v1776_v11  ;;  %v1796_v31 = vld [vmem:[%s2318_s12] ss:$20 sps:$4 sm:$0xff]   ;;  %v1798_v32 = vld [vmem:[%s2318_s12 + $0x4] ss:$20 sps:$4 sm:$0xff]   ;;  %v1800_v35 = vld [vmem:[%s2318_s12 + $0x8] ss:$20 sps:$4 sm:$0xff]  }
  0x94   : > { %1607 = vmatprep.subr.bf16.mxu1 %v1779_v14  ;;  %736 = vmatprep.mubr.bf16.mxu0 %v1798_v32  ;;  %v1802_v36 = vld [vmem:[%s2318_s12 + $0xc] ss:$20 sps:$4 sm:$0xff]   ;;  %v1811_v41 = vld [vmem:[%s2318_s12 + $0x10] ss:$20 sps:$4 sm:$0xff]   ;;  %s1990_s12 = scalar_lea.vmem %s2348_s17, 512 }
  0x95   : > { %1586 = vmatpush3.bf16.msra.mxu0 %v1778_v13  ;;  %777 = vmatprep.mubr.bf16.mxu1 %v1802_v36  ;;  %v1805_v39 = vld [vmem:[#allocation5 + $0x110] sm:$0xff]   ;;  %v1806_v40 = vld [vmem:[#allocation5 + $0x118] sm:$0xff]   ;;  %v1808_v43 = vld [vmem:[#allocation5 + $0x128] sm:$0xff]   ;;  %p1991_p0 = scmp.ne.s32.totalorder %s2348_s17, %s1990_s12  ;;  %p1998_p2 = scmp.lt.s32.totalorder %s1996_s10, %s1990_s12 }
  0x96   : > { %1587 = vmatprep.subr.bf16.mxu0 %v1781_v16  ;;  %v1809_v44 = vld [vmem:[#allocation5 + $0x130] sm:$0xff]   ;;  %v1810_v45 = vld [vmem:[#allocation5 + $0x138] sm:$0xff]   ;;  %v1812_v46 = vld [vmem:[#allocation7 + $0x40] sm:$0xff]  }
  0x97   : > { %1608 = vmatpush3.bf16.msra.mxu1 %v1780_v15  ;;  %v1813_v47 = vld [vmem:[#allocation7] sm:$0xff]   ;;  %v1814_v48 = vld [vmem:[#allocation7 + $0x48] sm:$0xff]   ;;  %v1816_v50 = vld [vmem:[#allocation7 + $0x50] sm:$0xff]   ;;  %p1992_p3 = pnand %p1991_p0, %p2266_p5  ;;  %p1999_p1 = por %p1998_p2, %p1997_p11 }
  0x98   : > { %1609 = vmatprep.subr.bf16.mxu1 %v1783_v18  ;;  %v1815_v49 = vld [vmem:[#allocation7 + $0x8] sm:$0xff]   ;;  %v1817_v51 = vld [vmem:[#allocation7 + $0x10] sm:$0xff]   ;;  %v1818_v52 = vld [vmem:[#allocation7 + $0x58] sm:$0xff]  }
  0x99   : > { %1588 = vmatpush3.bf16.msra.mxu0 %v1782_v17  ;;  %v1819_v53 = vld [vmem:[#allocation7 + $0x18] sm:$0xff]   ;;  %v1820_v54 = vld [vmem:[#allocation7 + $0x60] sm:$0xff]   ;;  %v1822_v56 = vld [vmem:[#allocation7 + $0x68] sm:$0xff]   ;;  %p1993_p7 = pneg %p1992_p3 }
  0x9a   : > { %1589 = vmatprep.subr.bf16.mxu0 %v1785_v20  ;;  %v1821_v55 = vld [vmem:[#allocation7 + $0x20] sm:$0xff]   ;;  %v1823_v57 = vld [vmem:[#allocation7 + $0x28] sm:$0xff]   ;;  %v1824_v58 = vld [vmem:[#allocation7 + $0x70] sm:$0xff]  }
  0x9b   : > { %1610 = vmatpush3.bf16.msra.mxu1 %v1784_v19  ;;  %v1825_v59 = vld [vmem:[#allocation7 + $0x30] sm:$0xff]   ;;  %v1826_v60 = vld [vmem:[#allocation7 + $0x78] sm:$0xff]   ;;  %p2000_p4 = pnand %p1999_p1, %p1993_p7 }
  0x9c   : > { %1611 = vmatprep.subr.bf16.mxu1 %v1787_v22  ;;  %v1827_v61 = vld [vmem:[#allocation7 + $0x38] sm:$0xff]   ;;  %v1828_v62 = vld [vmem:[#allocation8] ss:$16 sps:$4 sm:$0xff]   ;;  %v1830_v63 = vld [vmem:[#allocation8 + $0x4] ss:$16 sps:$4 sm:$0xff]  }
  0x9d   : > { %1590 = vmatpush3.bf16.msra.mxu0 %v1786_v21  ;;  %v1833_v0 = vld [vmem:[#allocation8 + $0xc] ss:$16 sps:$4 sm:$0xff]   ;;  %v1836_v1 = vld [vmem:[#allocation8 + $0x24] ss:$16 sps:$4 sm:$0xff]   ;;  %v1834_v2 = vld [vmem:[#allocation8 + $0x20] ss:$16 sps:$4 sm:$0xff]  }
  0x9e   : > { %1591 = vmatprep.subr.bf16.mxu0 %v1789_v24  ;;  %v1842_v3 = vld [vmem:[#allocation8 + $0x44] ss:$16 sps:$4 sm:$0xff]   ;;  %v1840_v4 = vld [vmem:[#allocation8 + $0x40] ss:$16 sps:$4 sm:$0xff]   ;;  %v1839_v36 = vld [vmem:[#allocation8 + $0x2c] ss:$16 sps:$4 sm:$0xff]  }
  0x9f   : > { %1612 = vmatpush3.bf16.msra.mxu1 %v1788_v23  ;;  %v1848_v5 = vld [vmem:[#allocation8 + $0x64] ss:$16 sps:$4 sm:$0xff]   ;;  %v1846_v6 = vld [vmem:[#allocation8 + $0x60] ss:$16 sps:$4 sm:$0xff]  }
  0xa0   : > { %1613 = vmatprep.subr.bf16.mxu1 %v1791_v26  ;;  %v1854_v7 = vld [vmem:[#allocation8 + $0x84] ss:$16 sps:$4 sm:$0xff]   ;;  %v1852_v8 = vld [vmem:[#allocation8 + $0x80] ss:$16 sps:$4 sm:$0xff]  }
  0xa1   : > { %1592 = vmatpush3.bf16.msra.mxu0 %v1790_v25  ;;  %v1468_v10 = vld [vmem:[%s2398_s2] ss:$0 sm:$0xff] }
  0xa2   : > { %1593 = vmatprep.subr.bf16.mxu0 %v1793_v28 }
  0xa3   : > { %1614 = vmatpush3.bf16.msra.mxu1 %v1792_v27 }
  0xa4   : > { %1615 = vmatprep.subr.bf16.mxu1 %v1795_v30 }
  0xa5   : > { %1594 = vmatpush3.bf16.msra.mxu0 %v1794_v29 }
  0xa6   : > { %1654 = vmatprep.subr.bf16.mxu0 %v2076_v33 }
  0xa7   : > { %1616 = vmatpush3.bf16.msra.mxu1 %v1799_v34  ;;  %v1831_v34 = vld [vmem:[#allocation8 + $0x8] ss:$16 sps:$4 sm:$0xff]  }
  0xa8   : > { %737 = vmatmul.mubr.bf16.vlgmr.msra.gmra.mrb[0].mxu0 %v1796_v31  ;;  %1632 = vmatprep.subr.bf16.mxu1 %v1812_v46  ;;  %v1858_v46 = vld [vmem:[#allocation8 + $0xa0] ss:$16 sps:$4 sm:$0xff]  }
  0xa9   : > { %1670 = vmatprep.mubr.msk.bf16.mxu0 %vm2077_vm0, %v2076_v33  ;;  %1655 = vmatpush3.bf16.msra.mxu0 %v1803_v37  ;;  %v1837_v37 = vld [vmem:[#allocation8 + $0x28] ss:$16 sps:$4 sm:$0xff]  }
  0xaa   : > { %778 = vmatmul.mubr.bf16.vlgmr.msra.gmra.mrb[0].mxu1 %v1800_v35  ;;  %1656 = vmatprep.subr.bf16.mxu0 %v2076_v33 }
  0xab   : > { %997 = vmatprep.mubr.bf16.mxu1 %v1811_v41  ;;  %1633 = vmatpush3.bf16.msra.mxu1 %v1813_v47  ;;  %v1861_v47 = vld [vmem:[#allocation8 + $0xa8] ss:$16 sps:$4 sm:$0xff]  }
  0xac   : > { %1634 = vmatprep.subr.bf16.mxu1 %v1814_v48  ;;  %v1866_v48 = vld [vmem:[#allocation8 + $0xc4] ss:$16 sps:$4 sm:$0xff]  }
  0xad   : > { %1657 = vmatpush3.bf16.msra.mxu0 %v1804_v38  ;;  %v1845_v38 = vld [vmem:[#allocation8 + $0x4c] ss:$16 sps:$4 sm:$0xff]  }
  0xae   : > { %1658 = vmatprep.subr.bf16.mxu0 %v2076_v33 }
  0xaf   : > { %1635 = vmatpush3.bf16.msra.mxu1 %v1815_v49  ;;  %v1869_v49 = vld [vmem:[#allocation8 + $0xcc] ss:$16 sps:$4 sm:$0xff]  }
  0xb0   : > { %1636 = vmatprep.subr.bf16.mxu1 %v1816_v50  ;;  %v1864_v50 = vld [vmem:[#allocation8 + $0xc0] ss:$16 sps:$4 sm:$0xff]  }
  0xb1   : > { %1659 = vmatpush3.bf16.msra.mxu0 %v1805_v39  ;;  %v1843_v39 = vld [vmem:[#allocation8 + $0x48] ss:$16 sps:$4 sm:$0xff]  }
  0xb2   : > { %1660 = vmatprep.subr.bf16.mxu0 %v2076_v33 }
  0xb3   : > { %1637 = vmatpush3.bf16.msra.mxu1 %v1817_v51  ;;  %v1867_v51 = vld [vmem:[#allocation8 + $0xc8] ss:$16 sps:$4 sm:$0xff]  }
  0xb4   : > { %1638 = vmatprep.subr.bf16.mxu1 %v1818_v52  ;;  %v1872_v52 = vld [vmem:[#allocation8 + $0xe4] ss:$16 sps:$4 sm:$0xff]  }
  0xb5   : > { %1661 = vmatpush3.bf16.msra.mxu0 %v1806_v40  ;;  %v1851_v40 = vld [vmem:[#allocation8 + $0x6c] ss:$16 sps:$4 sm:$0xff]  }
  0xb6   : > { %1662 = vmatprep.subr.bf16.mxu0 %v2076_v33 }
  0xb7   : > { %1639 = vmatpush3.bf16.msra.mxu1 %v1819_v53  ;;  %v1875_v53 = vld [vmem:[#allocation8 + $0xec] ss:$16 sps:$4 sm:$0xff]  }
  0xb8   : > { %1640 = vmatprep.subr.bf16.mxu1 %v1820_v54  ;;  %v1870_v54 = vld [vmem:[#allocation8 + $0xe0] ss:$16 sps:$4 sm:$0xff]  }
  0xb9   : > { %1663 = vmatpush3.bf16.msra.mxu0 %v1807_v42  ;;  %v1857_v42 = vld [vmem:[#allocation8 + $0x8c] ss:$16 sps:$4 sm:$0xff]  }
  0xba   : > { %1664 = vmatprep.subr.bf16.mxu0 %v2076_v33 }
  0xbb   : > { %1641 = vmatpush3.bf16.msra.mxu1 %v1821_v55  ;;  %v1873_v55 = vld [vmem:[#allocation8 + $0xe8] ss:$16 sps:$4 sm:$0xff]  }
  0xbc   : > { %1642 = vmatprep.subr.bf16.mxu1 %v1822_v56  ;;  %v2078_v56 = vmov 0  }
  0xbd   : > { %1665 = vmatpush3.bf16.msra.mxu0 %v1808_v43  ;;  %v1855_v43 = vld [vmem:[#allocation8 + $0x88] ss:$16 sps:$4 sm:$0xff]  }
  0xbe   : > { %1666 = vmatprep.subr.bf16.mxu0 %v2076_v33 }
  0xbf   : > { %1643 = vmatpush3.bf16.msra.mxu1 %v1823_v57 }
  0xc0   : > { %1644 = vmatprep.subr.bf16.mxu1 %v1824_v58  ;;  %v1514_v58 = vld [vmem:[%s2400_s4] ss:$0 sm:$0xff] }
  0xc1   : > { %1667 = vmatpush3.bf16.msra.mxu0 %v1809_v44  ;;  %v1860_v44 = vld [vmem:[#allocation8 + $0xa4] ss:$16 sps:$4 sm:$0xff]  }
  0xc2   : > { %1668 = vmatprep.subr.bf16.mxu0 %v2076_v33 }
  0xc3   : > { %1645 = vmatpush3.bf16.msra.mxu1 %v1825_v59 }
  0xc4   : > { %1646 = vmatprep.subr.bf16.mxu1 %v1826_v60 }
  0xc5   : > { %1669 = vmatpush3.bf16.msra.mxu0 %v1810_v45  ;;  %v1863_v45 = vld [vmem:[#allocation8 + $0xac] ss:$16 sps:$4 sm:$0xff]  }
  0xc6   : > { %1223 = vmatprep.subr.bf16.mxu0 %v1830_v63 }
  0xc7   : > { %1647 = vmatpush3.bf16.msra.mxu1 %v1827_v61 }
  0xc8   : > { %1671 = vmatmul.mubr.bf16.vlgmr.msra.gmra.mrb[4].mxu0 %v1811_v41  ;;  %1266 = vmatprep.subr.bf16.mxu1 %v1833_v0  ;;  %v1849_v41 = vld [vmem:[#allocation8 + $0x68] ss:$16 sps:$4 sm:$0xff]  }
  0xc9   : > { %1224 = vmatpush1.bf16.msra.mxu0 %v1828_v62  ;;  %1255 = vmatprep.mubr.bf16.mxu0 %v2078_v56 }
  0xca   : > { %1225 = vmatprep.subr.bf16.mxu0 %v1836_v1 }
  0xcd   : > { %1226 = vmatpush1.bf16.msra.mxu0 %v1834_v2 }
  0xce   : > { %1227 = vmatprep.subr.bf16.mxu0 %v1842_v3 }
  0xd1   : > { %1228 = vmatpush1.bf16.msra.mxu0 %v1840_v4 }
  0xd2   : > { %1229 = vmatprep.subr.bf16.mxu0 %v1848_v5  ;;  %v1043_v5 = vlaneseq }
  0xd5   : > { %1230 = vmatpush1.bf16.msra.mxu0 %v1846_v6  ;;  %v1044_v6 = vshrl.u32 %v1043_v5, 7 }
  0xd6   : > { %1231 = vmatprep.subr.bf16.mxu0 %v1854_v7 }
  0xd7   : > { %v1045_v7 = vsub.s32 0, %v1044_v6 }
  0xd9   : > { %1232 = vmatpush1.bf16.msra.mxu0 %v1852_v8  ;;  %v1053_v8 = vsub.s32 2, %v1044_v6 }
  0xda   : > { %1233 = vmatprep.subr.bf16.mxu0 %v1860_v44 }
  0xdd   : > { %1234 = vmatpush1.bf16.msra.mxu0 %v1858_v46 }
  0xde   : > { %1235 = vmatprep.subr.bf16.mxu0 %v1866_v48 }
  0xe1   : > { %1236 = vmatpush1.bf16.msra.mxu0 %v1864_v50 }
  0xe2   : > { %1237 = vmatprep.subr.bf16.mxu0 %v1872_v52 }
  0xe5   : > { %1238 = vmatpush1.bf16.msra.mxu0 %v1870_v54 }
 0x17b   : > { %v1595_v9 = vpop.f32.mrb[0].mxu0 }
 0x17c   : > { %v1596_v11 = vpop.f32.mrb[1].mxu0 }
 0x17d   : > { %v1597_v12 = vadd.f32 %v1596_v11, %v1595_v9  ;;  %v1598_v13 = vpop.f32.mrb[2].mxu0  ;;  %v1617_v14 = vpop.f32.mrb[0].mxu1  ;;  %v1041_v9 = vld [vmem:[%s2402_s6] sm:$0xf]  ;;  %v1057_v11 = vsub.s32 3, %v1044_v6 }
 0x17e   : > { %v1599_v15 = vpop.f32.mrb[3].mxu0  ;;  %v1618_v18 = vpop.f32.mrb[1].mxu1 }
 0x17f   : > { %v739_v16 = vadd.f32 %v1597_v12, %v1468_v10  ;;  %v1600_v17 = vadd.f32 %v1599_v15, %v1598_v13  ;;  %v1619_v19 = vadd.f32 %v1618_v18, %v1617_v14  ;;  %v1620_v20 = vpop.f32.mrb[2].mxu1  ;;  %v1046_v12 = vrot.slane %v1041_v9, %v1045_v7 }
 0x180   : > { %v1621_v22 = vpop.f32.mrb[3].mxu1  ;;  %v1054_v13 = vrot.slane %v1041_v9, %v1053_v8  ;;  %v1058_v15 = vrot.slane %v1041_v9, %v1057_v11 }
 0x181   : > { %v742_v21 = vadd.f32 %v1600_v17, %v1468_v10  ;;  %v1622_v23 = vadd.f32 %v1621_v22, %v1620_v20  ;;  %v780_v24 = vadd.f32 %v1619_v19, %v739_v16  ;;  %v1049_v10 = vsub.s32 1, %v1044_v6 }
 0x183   : > { %v783_v25 = vadd.f32 %v1622_v23, %v742_v21  ;;  %v1050_v14 = vrot.slane %v1041_v9, %v1049_v10 }
 0x19b   : > { %v820_v26 = vpop.f32.mrb[4].mxu0 }
 0x19c   : > { %v821_v27 = vadd.f32 %v820_v26, %v780_v24  ;;  %v1672_v28 = vpop.f32.mrb[5].mxu0 }
 0x19d   : > { %v823_v29 = vpop.f32.mrb[6].mxu0 }
 0x19e   : > { %v824_v30 = vadd.f32 %v823_v29, %v783_v25  ;;  %v1673_v31 = vpop.f32.mrb[7].mxu0  ;;  %v827_v32 = vmax.f32 %v821_v27, 0.0 }
 0x1a0   : > { %v828_v33 = vmax.f32 %v824_v30, 0.0 }
 0x1a2   : > { %v829_v35 = vpack.c.bf16 %v828_v33, %v827_v32 }
 0x1a4   : > { %998 = vmatmul.mubr.bf16.vlgmr.msra.gmra.mrb[4].mxu1 %v829_v35 }
 0x1a5   : > { %1267 = vmatpush1.bf16.msra.mxu1 %v1831_v34  ;;  %1298 = vmatprep.mubr.bf16.mxu1 %v2078_v56 }
 0x1a6   : > { %1268 = vmatprep.subr.bf16.mxu1 %v1839_v36 }
 0x1a9   : > { %1269 = vmatpush1.bf16.msra.mxu1 %v1837_v37 }
 0x1aa   : > { %1270 = vmatprep.subr.bf16.mxu1 %v1845_v38 }
 0x1ad   : > { %1271 = vmatpush1.bf16.msra.mxu1 %v1843_v39 }
 0x1ae   : > { %1272 = vmatprep.subr.bf16.mxu1 %v1851_v40 }
 0x1b1   : > { %1273 = vmatpush1.bf16.msra.mxu1 %v1849_v41 }
 0x1b2   : > { %1274 = vmatprep.subr.bf16.mxu1 %v1857_v42 }
 0x1b5   : > { %1275 = vmatpush1.bf16.msra.mxu1 %v1855_v43 }
 0x1b6   : > { %1276 = vmatprep.subr.bf16.mxu1 %v1863_v45 }
 0x1b9   : > { %1277 = vmatpush1.bf16.msra.mxu1 %v1861_v47 }
 0x1ba   : > { %1278 = vmatprep.subr.bf16.mxu1 %v1869_v49 }
 0x1bd   : > { %1279 = vmatpush1.bf16.msra.mxu1 %v1867_v51 }
 0x1be   : > { %1280 = vmatprep.subr.bf16.mxu1 %v1875_v53 }
 0x1c1   : > { %1281 = vmatpush1.bf16.msra.mxu1 %v1873_v55 }
 0x277   : > { %v1648_v57 = vpop.f32.mrb[4].mxu1 }
 0x278   : > { %v1649_v59 = vpop.f32.mrb[5].mxu1 }
 0x279   : > { %v1650_v60 = vadd.f32 %v1649_v59, %v1648_v57  ;;  %v1651_v61 = vpop.f32.mrb[6].mxu1 }
 0x27a   : > { %v1652_v62 = vpop.f32.mrb[7].mxu1 }
 0x27b   : > { %v1000_v63 = vadd.f32 %v1650_v60, %v1514_v58  ;;  %v1653_v0 = vadd.f32 %v1652_v62, %v1651_v61 }
 0x27d   : > { %v1003_v1 = vadd.f32 %v1653_v0, %v1514_v58  ;;  %v1006_v2 = vmax.f32 %v1000_v63, 0.0 }
 0x27f   : > { %v1007_v3 = vmax.f32 %v1003_v1, 0.0 }
 0x281   : > { %v1008_v4 = vpack.c.bf16 %v1007_v3, %v1006_v2 }
 0x283   : > { %1256 = vmatmul.mubr.bf16.vlgmr.msra.gmra.mrb[8].mxu0 %v1008_v4  ;;  %1299 = vmatmul.mubr.bf16.vlgmr.msra.gmra.mrb[8].mxu1 %v1008_v4 }
 0x356   : > { %v1257_v16 = vpop.f32.mrb[8].mxu0  ;;  %v1300_v17 = vpop.f32.mrb[8].mxu1 }
 0x357   : > { %v1258_v18 = vadd.f32 %v1257_v16, %v1046_v12  ;;  %v1301_v19 = vadd.f32 %v1300_v17, %v1054_v13  ;;  %v1259_v20 = vpop.f32.mrb[9].mxu0  ;;  %v1302_v21 = vpop.f32.mrb[9].mxu1 }
 0x358   : > { %v1260_v22 = vadd.f32 %v1259_v20, %v1050_v14  ;;  %v1303_v23 = vadd.f32 %v1302_v21, %v1058_v15  ;;  %v1261_v24 = vpop.f32.mrb[10].mxu0  ;;  %v1304_v25 = vpop.f32.mrb[10].mxu1 }
 0x359   : > { %v1262_v26 = vadd.f32 %v1261_v24, %v1046_v12  ;;  %v1305_v27 = vadd.f32 %v1304_v25, %v1054_v13  ;;  %v1263_v28 = vpop.f32.mrb[11].mxu0  ;;  %v1306_v29 = vpop.f32.mrb[11].mxu1 }
 0x35a   : > { %v1573_v30 = vpack.c.bf16 %v1260_v22, %v1258_v18  ;;  %v1574_v31 = vpack.c.bf16 %v1303_v23, %v1301_v19  ;;  %v1264_v32 = vadd.f32 %v1263_v28, %v1050_v14  ;;  %v1307_v33 = vadd.f32 %v1306_v29, %v1058_v15 }
 0x35c   : > { %1333 = vst [vmem:[%s341_s14] sm:$0xff] %v1573_v30  ;;  %1334 = vst [vmem:[%s341_s14 + $0x8] sm:$0xff] %v1574_v31  ;;  %v1575_v34 = vpack.c.bf16 %v1264_v32, %v1262_v26  ;;  %v1576_v35 = vpack.c.bf16 %v1307_v33, %v1305_v27 }
 0x35e   : > { %1335 = vst [vmem:[%s341_s14 + $0x10] sm:$0xff] %v1575_v34  ;;  %1336 = vst [vmem:[%s341_s14 + $0x18] sm:$0xff] %v1576_v35 }
 0x35f   : > { %2003 = shalt.err (!%p2000_p4)
}
 0x360   : > { %s2004_s11 = scalar_lea.hbm %s2353_s29, 512  ;;  %s2008_s16 = scalar_lea.hbm %s2403_s7, 2048 }
 0x361   : > { %p2005_p9 = scmp.ne.s32.totalorder %s2353_s29, %s2004_s11  ;;  %p2009_p8 = scmp.lt.u32.totalorder %s2353_s29, %s2403_s7 }
 0x362   : > { %p2010_p12 = scmp.lt.u32.totalorder %s2008_s16, %s2004_s11  ;;  %p2012_p0 = scmp.lt.u32.totalorder %s2004_s11, %s2353_s29 }
 0x363   : > { %p2006_p13 = pnand %p2005_p9, %p2266_p5 }
 0x364   : > { %p2011_p6 = por %p2010_p12, %p2009_p8 }
 0x365   : > { %p2007_p10 = pneg %p2006_p13 }
 0x366   : > { %p2013_p3 = por %p2012_p0, %p2011_p6 }
 0x368   : > { %p2014_p7 = pnand %p2013_p3, %p2007_p10 }
 0x36a   : > { %2017 = shalt.err (!%p2014_p7)
}
 0x36b   : > { %s2080_s18 = smov 256   ;;  %s2081_s23 = smov 16  }
 0x36c   : > { %1691 = dma.vmem_to_hbm [thread:$0]  (%p2266_p5), %s2348_s17, 512, %s2353_s29, %s1338_s28, %s2080_s18, %s2080_s18, %s2081_s23  }
 0x36d PF: > { %s2423_s12 = sld [smem:[#allocation15_spill]]  ;;  %p1718_p11 = scmp.ge.s32.totalorder %s2064_s27, 2 }
 0x36e   : > { %s1367_s30 = sand.u32 1, %s2052_s24  }
 0x36f   : > { %s1368_s9 = scalar_lea.sflag [#allocation4], %s1367_s30 }
 0x373   : > { %p2424_p2 = scmp.ne.s32.totalorder %s2423_s12, 0 }
 0x375   : > { %p1708_p1 = pnand %p1718_p11, %p2424_p2 }
 0x377   : > { %2047 = dma.done.wait (!%p1708_p1), %s1368_s9, 512  }
 0x378   : > { %2049 = vsyncadd (!%p1708_p1), %s1368_s9, 4294966784  ;;  %p22_p4 = scmp.ge.s32.totalorder %s2252_s8, 6   ;;  %s2425_s24 = smov %s2056_s25 }
 0x379   : > { %s2426_s25 = smov %s2060_s26  ;;  %s2427_s26 = smov %s2262_s19 }
 0x37a   : > { %s2428_s27 = smov %s2252_s8  ;;  %24 = sbr.rel (!%p22_p4) target bundleno = 7 (0x7), region = 105 }
 0x381   :  { %1373 = vsyncpa [#allocation3], 1 }
 0x382   :  { %1375 = vsyncpa [#allocation3 + $0x1], 1 }
 0x383   :  { %1376 = vsyncpa [#allocation6], 1 }
 0x384   :  { %1377 = vsyncpa [#allocation9], 1 }
 0x385   :  { %1378 = vsyncpa [#allocation4], 1 }
 0x386   :  { %1380 = vsyncpa [#allocation4 + $0x1], 1 }

</bundles_post_ra>
